<compile_context>
chip_gen: v7x
topology: tpu7x:2x2x1
jax: 0.10.0
libtpu: 0.0.40
codegen_flags: <defaults>
</compile_context>

<pallas_src>
import jax
import jax.numpy as jnp
from jax.experimental import pallas as pl
from jax.experimental.pallas import tpu as pltpu


def _round_up(x: int, m: int) -> int:
    return ((x + m - 1) // m) * m


def _make_ce_kernel(tc: int, c_real: int, use_bf16_exp: bool = False):
    """Per-row cross-entropy (LSE - label_logit) with an online LSE over class tiles."""
    needs_col_mask = (c_real % tc) != 0   # static: only pay mask ops when C is ragged

    def kernel(logits_ref, gl_ref,        # inputs: (tn, tc) logits tile, (tn, 1) label logit
               ce_ref,                    # output: (tn, 1) per-sample CE
               m_scr, l_scr):             # scratch: running max / running sum(exp)
        j = pl.program_id(1)              # class-tile index (innermost reduction axis)
        nj = pl.num_programs(1)

        # (Re)initialize the per-row-tile online-LSE state at the first class tile.
        @pl.when(j == 0)
        def _():
            m_scr[...] = jnp.full(m_scr.shape, -jnp.inf, m_scr.dtype)
            l_scr[...] = jnp.zeros(l_scr.shape, l_scr.dtype)

        x = logits_ref[...].astype(jnp.float32)          # f32 compute, native-dtype HBM traffic

        if needs_col_mask:
            # Mask out-of-range class columns of the ragged last tile (their VMEM
            # contents are unspecified).  -inf -> exp underflows to 0.
            col = jax.lax.broadcasted_iota(jnp.int32, x.shape, 1)
            x = jnp.where(col < (c_real - j * tc), x, -jnp.inf)

        # ---- online log-sum-exp over the class axis ----
        m_prev = m_scr[...]
        m_new = jnp.maximum(m_prev, jnp.max(x, axis=-1, keepdims=True))
        # Guard: if a row's running max is still -inf, shift by 0 instead (avoids
        # exp(-inf - (-inf)) = NaN); exp(-inf - 0) = 0 keeps the math consistent.
        m_safe = jnp.where(m_new == -jnp.inf, jnp.float32(0.0), m_new)
        alpha = jnp.exp(m_prev - m_safe)
        shifted = x - m_safe
        if use_bf16_exp:
            # Optional v6e/v7x EUP throughput trade (bf16 exp, f32 accumulation).
            p = jnp.exp(shifted.astype(jnp.bfloat16)).astype(jnp.float32)
        else:
            p = jnp.exp(shifted)
        l_scr[...] = l_scr[...] * alpha + jnp.sum(p, axis=-1, keepdims=True)
        m_scr[...] = m_new

        # ---- finalize this row tile after the last class tile ----
        @pl.when(j == nj - 1)
        def _():
            lse = m_scr[...] + jnp.log(l_scr[...])
            ce_ref[...] = lse - gl_ref[...]

    return kernel


def cce_gt_loss(logits, labels, clean_indexs, *, block_n=None, block_c=None,
                vmem_limit_bytes=48 * 1024 * 1024, use_bf16_exp=False):
    """Pallas TPU implementation of CCE_GTLoss.forward.

    logits:        [N, C] float (bf16/f16/f32 — streamed in native dtype)
    labels:        [N]    int   (class indices)
    clean_indexs:  [N]    bool  (selection mask)
    returns scalar float32 loss.
    """
    n, c = logits.shape
    itemsize = jnp.dtype(logits.dtype).itemsize
    sub = {4: 8, 2: 16, 1: 32}.get(itemsize, 8)   # dtype-aware sublane rounding

    if block_n is None:
        block_n = 512
    if block_c is None:
        # Keep the double-buffered native tile + f32/exp temporaries well inside the
        # 48 MiB scoped-VMEM budget (v7x has only 64 MiB physical per TensorCore).
        block_c = 4096 if itemsize <= 2 else 2048

    tn = _round_up(min(block_n, _round_up(n, sub)), sub)
    tc = _round_up(min(block_c, _round_up(c, 128)), 128)
    np_ = _round_up(n, tn)
    ni = np_ // tn
    nj = pl.cdiv(c, tc)

    # N-element label-logit gather in the wrapper (negligible HBM traffic) instead of
    # an in-kernel iota/one-hot over every logit element.
    labels_i32 = labels.astype(jnp.int32)
    label_logit = jnp.take_along_axis(logits, labels_i32[:, None], axis=-1).astype(jnp.float32)
    if np_ > n:
        label_logit = jnp.pad(label_logit, ((0, np_ - n), (0, 0)))

    kernel = _make_ce_kernel(tc=tc, c_real=c, use_bf16_exp=use_bf16_exp)

    ce = pl.pallas_call(
        kernel,
        out_shape=jax.ShapeDtypeStruct((np_, 1), jnp.float32),
        grid_spec=pltpu.PrefetchScalarGridSpec(
            num_scalar_prefetch=0,
            grid=(ni, nj),
            in_specs=[
                # logits tile, native dtype, pipelined/double-buffered; ragged edges
                # handled in-kernel (no wrapper-side pad of the big array).
                pl.BlockSpec((tn, tc), lambda i, j: (i, j)),
                # label logit: constant over the class axis -> one DMA per row tile.
                pl.BlockSpec((tn, 1), lambda i, j: (i, 0)),
            ],
            out_specs=pl.BlockSpec((tn, 1), lambda i, j: (i, 0)),
            scratch_shapes=[
                pltpu.VMEM((tn, 1), jnp.float32),   # running max
                pltpu.VMEM((tn, 1), jnp.float32),   # running sum(exp)
            ],
        ),
        compiler_params=pltpu.CompilerParams(
            # Row tiles are fully independent (per-row-tile outputs, no shared
            # accumulator) -> "parallel" lets v7x shard them across its 2 TCs.
            dimension_semantics=("parallel", "arbitrary"),
            vmem_limit_bytes=vmem_limit_bytes,
        ),
    )(logits, label_logit)

    # O(N) wrapper epilogue: masked sum, count, count==0 fallback, divide.
    ce = ce[:n, 0]                                  # drop garbage rows of the ragged tile
    mask = clean_indexs.astype(jnp.float32)
    count = jnp.sum(mask)
    size = jnp.where(count == 0.0, jnp.float32(n), count)
    return jnp.sum(ce * mask) / size


def _reference(logits, labels, clean_indexs):
    """Pure-JAX reference matching the PyTorch module."""
    logits32 = logits.astype(jnp.float32)
    lse = jax.nn.logsumexp(logits32, axis=-1)
    label_logit = jnp.take_along_axis(
        logits32, labels[:, None].astype(jnp.int32), axis=-1)[:, 0]
    ce = lse - label_logit
    mask = clean_indexs.astype(jnp.float32)
    count = jnp.sum(mask)
    size = jnp.where(count == 0.0, jnp.float32(logits.shape[0]), count)
    return jnp.sum(ce * mask) / size


if __name__ == "__main__":
    key = jax.random.PRNGKey(0)
    k1, k2, k3 = jax.random.split(key, 3)

    # Case 1: f32 logits, shapes deliberately NOT tile multiples -> exercises the
    # ragged row tile, the ragged class tile and the multi-tile online LSE
    # (grid = (2 row tiles, 3 class tiles)).
    N, C = 12, 300
    logits = jax.random.normal(k1, (N, C), dtype=jnp.float32)
    labels = jax.random.randint(k2, (N,), 0, C, dtype=jnp.int32)
    clean_indexs = jax.random.bernoulli(k3, p=0.5, shape=(N,))

    loss = jax.block_until_ready(
        cce_gt_loss(logits, labels, clean_indexs, block_n=8, block_c=128))
    ref = _reference(logits, labels, clean_indexs)
    assert jnp.allclose(loss, ref, rtol=1e-5, atol=1e-5), (loss, ref)

    # Case 2: bf16 logits with the default dtype-aware tiling (sublane=16 path,
    # single ragged tile in both dims).
    N2, C2 = 40, 520
    logits2 = jax.random.normal(k1, (N2, C2), dtype=jnp.float32).astype(jnp.bfloat16)
    labels2 = jax.random.randint(k2, (N2,), 0, C2, dtype=jnp.int32)
    clean2 = jax.random.bernoulli(k3, p=0.3, shape=(N2,))
    loss2 = jax.block_until_ready(cce_gt_loss(logits2, labels2, clean2))
    ref2 = _reference(logits2, labels2, clean2)
    assert jnp.allclose(loss2, ref2, rtol=2e-3, atol=2e-3), (loss2, ref2)

    # Case 3: no clean samples -> size = N fallback (loss = 0), like the PyTorch module.
    no_clean = jnp.zeros((N,), dtype=bool)
    loss0 = jax.block_until_ready(
        cce_gt_loss(logits, labels, no_clean, block_n=8, block_c=128))
    ref0 = _reference(logits, labels, no_clean)
    assert jnp.allclose(loss0, ref0, rtol=1e-5, atol=1e-5), (loss0, ref0)

    print("KERNEL_OK")
</pallas_src>

<mosaic_0001>
module attributes {stable_mosaic.version = 11 : i64} {
  func.func @kernel(%arg0: i32, %arg1: i32, %arg2: memref<8x128xf32, #tpu.memory_space<vmem>>, %arg3: memref<8x1xf32, #tpu.memory_space<vmem>>, %arg4: memref<8x1xf32, #tpu.memory_space<vmem>>, %arg5: memref<8x1xf32, #tpu.memory_space<vmem>>, %arg6: memref<8x1xf32, #tpu.memory_space<vmem>>) attributes {dimension_semantics = [#tpu.dimension_semantics<parallel>, #tpu.dimension_semantics<arbitrary>], iteration_bounds = array<i64: 2, 3>, scalar_prefetch = 0 : i64, scratch_operands = 2 : i64, tpu.core_type = #tpu.core_type<tc>, window_params = [{transform_indices = @transform_0, window_bounds = array<i64: 8, 128>}, {transform_indices = @transform_1, window_bounds = array<i64: 8, 1>}, {transform_indices = @transform_2, window_bounds = array<i64: 8, 1>}]} {
    %c0_i32 = arith.constant 0 : i32
    %0 = arith.cmpi eq, %arg1, %c0_i32 : i32
    %1 = arith.extui %0 : i1 to i32
    %c0_i32_0 = arith.constant 0 : i32
    %2 = arith.cmpi ne, %1, %c0_i32_0 : i32
    scf.if %2 {
      %cst_15 = arith.constant 0xFF800000 : f32
      %34 = vector.broadcast %cst_15 : f32 to vector<8x1xf32>
      %c0_16 = arith.constant 0 : index
      %c0_17 = arith.constant 0 : index
      %35 = vector.load %arg5[%c0_16, %c0_17] : memref<8x1xf32, #tpu.memory_space<vmem>>, vector<8x1xf32>
      tpu.vector_store %arg5[%c0_16, %c0_17], %34 {strides = array<i32>} : memref<8x1xf32, #tpu.memory_space<vmem>>, vector<8x1xf32>,
      %cst_18 = arith.constant 0.000000e+00 : f32
      %36 = vector.broadcast %cst_18 : f32 to vector<8x1xf32>
      %c0_19 = arith.constant 0 : index
      %c0_20 = arith.constant 0 : index
      %37 = vector.load %arg6[%c0_19, %c0_20] : memref<8x1xf32, #tpu.memory_space<vmem>>, vector<8x1xf32>
      tpu.vector_store %arg6[%c0_19, %c0_20], %36 {strides = array<i32>} : memref<8x1xf32, #tpu.memory_space<vmem>>, vector<8x1xf32>,
    } else {
    }
    %c0 = arith.constant 0 : index
    %c0_1 = arith.constant 0 : index
    %3 = vector.load %arg2[%c0, %c0_1] : memref<8x128xf32, #tpu.memory_space<vmem>>, vector<8x128xf32>
    %4 = tpu.iota {dimensions = array<i32: 1>} : vector<8x128xi32>
    %c128_i32 = arith.constant 128 : i32
    %5 = arith.muli %arg1, %c128_i32 : i32
    %c300_i32 = arith.constant 300 : i32
    %6 = arith.subi %c300_i32, %5 : i32
    %7 = vector.broadcast %6 : i32 to vector<8x128xi32>
    %8 = arith.cmpi slt, %4, %7 : vector<8x128xi32>
    %cst = arith.constant 0xFF800000 : f32
    %9 = vector.broadcast %cst : f32 to vector<8x128xf32>
    %10 = arith.select %8, %3, %9 : vector<8x128xi1>, vector<8x128xf32>
    %c0_2 = arith.constant 0 : index
    %c0_3 = arith.constant 0 : index
    %11 = vector.load %arg5[%c0_2, %c0_3] : memref<8x1xf32, #tpu.memory_space<vmem>>, vector<8x1xf32>
    %cst_4 = arith.constant dense<0xFF800000> : vector<8xf32>
    %12 = vector.multi_reduction <maximumf>, %10, %cst_4 [1] : vector<8x128xf32> to vector<8xf32>
    %13 = vector.shape_cast %12 : vector<8xf32> to vector<8x1xf32>
    %14 = arith.maximumf %11, %13 : vector<8x1xf32>
    %cst_5 = arith.constant 0xFF800000 : f32
    %15 = vector.broadcast %cst_5 : f32 to vector<8x1xf32>
    %16 = arith.cmpf oeq, %14, %15 : vector<8x1xf32>
    %cst_6 = arith.constant 0.000000e+00 : f32
    %17 = vector.broadcast %cst_6 : f32 to vector<8x1xf32>
    %18 = arith.select %16, %17, %14 : vector<8x1xi1>, vector<8x1xf32>
    %19 = arith.subf %11, %18 : vector<8x1xf32>
    %20 = math.exp %19 : vector<8x1xf32>
    %21 = vector.broadcast %18 : vector<8x1xf32> to vector<8x128xf32>
    %22 = arith.subf %10, %21 : vector<8x128xf32>
    %23 = math.exp %22 : vector<8x128xf32>
    %c0_7 = arith.constant 0 : index
    %c0_8 = arith.constant 0 : index
    %24 = vector.load %arg6[%c0_7, %c0_8] : memref<8x1xf32, #tpu.memory_space<vmem>>, vector<8x1xf32>
    %25 = arith.mulf %24, %20 : vector<8x1xf32>
    %cst_9 = arith.constant dense<0.000000e+00> : vector<8xf32>
    %26 = vector.multi_reduction <add>, %23, %cst_9 [1] : vector<8x128xf32> to vector<8xf32>
    %27 = vector.shape_cast %26 : vector<8xf32> to vector<8x1xf32>
    %28 = arith.addf %25, %27 : vector<8x1xf32>
    %c0_10 = arith.constant 0 : index
    %c0_11 = arith.constant 0 : index
    %29 = vector.load %arg6[%c0_10, %c0_11] : memref<8x1xf32, #tpu.memory_space<vmem>>, vector<8x1xf32>
    tpu.vector_store %arg6[%c0_10, %c0_11], %28 {strides = array<i32>} : memref<8x1xf32, #tpu.memory_space<vmem>>, vector<8x1xf32>,
    %c0_12 = arith.constant 0 : index
    %c0_13 = arith.constant 0 : index
    %30 = vector.load %arg5[%c0_12, %c0_13] : memref<8x1xf32, #tpu.memory_space<vmem>>, vector<8x1xf32>
    tpu.vector_store %arg5[%c0_12, %c0_13], %14 {strides = array<i32>} : memref<8x1xf32, #tpu.memory_space<vmem>>, vector<8x1xf32>,
    %c2_i32 = arith.constant 2 : i32
    %31 = arith.cmpi eq, %arg1, %c2_i32 : i32
    %32 = arith.extui %31 : i1 to i32
    %c0_i32_14 = arith.constant 0 : i32
    %33 = arith.cmpi ne, %32, %c0_i32_14 : i32
    scf.if %33 {
      %c0_15 = arith.constant 0 : index
      %c0_16 = arith.constant 0 : index
      %34 = vector.load %arg5[%c0_15, %c0_16] : memref<8x1xf32, #tpu.memory_space<vmem>>, vector<8x1xf32>
      %c0_17 = arith.constant 0 : index
      %c0_18 = arith.constant 0 : index
      %35 = vector.load %arg6[%c0_17, %c0_18] : memref<8x1xf32, #tpu.memory_space<vmem>>, vector<8x1xf32>
      %36 = math.log %35 : vector<8x1xf32>
      %37 = arith.addf %34, %36 : vector<8x1xf32>
      %c0_19 = arith.constant 0 : index
      %c0_20 = arith.constant 0 : index
      %38 = vector.load %arg3[%c0_19, %c0_20] : memref<8x1xf32, #tpu.memory_space<vmem>>, vector<8x1xf32>
      %39 = arith.subf %37, %38 : vector<8x1xf32>
      %c0_21 = arith.constant 0 : index
      %c0_22 = arith.constant 0 : index
      %40 = vector.load %arg4[%c0_21, %c0_22] : memref<8x1xf32, #tpu.memory_space<vmem>>, vector<8x1xf32>
      tpu.vector_store %arg4[%c0_21, %c0_22], %39 {strides = array<i32>} : memref<8x1xf32, #tpu.memory_space<vmem>>, vector<8x1xf32>,
    } else {
    }
    return
  }
  func.func @transform_0(%arg0: i32, %arg1: i32) -> (i32, i32) {
    %c0_i32 = arith.constant 0 : i32
    return %arg0, %arg1 : i32, i32
  }
  func.func @transform_1(%arg0: i32, %arg1: i32) -> (i32, i32) {
    %c0_i32 = arith.constant 0 : i32
    %c0_i32_0 = arith.constant 0 : i32
    return %arg0, %c0_i32 : i32, i32
  }
  func.func @transform_2(%arg0: i32, %arg1: i32) -> (i32, i32) {
    %c0_i32 = arith.constant 0 : i32
    %c0_i32_0 = arith.constant 0 : i32
    return %arg0, %c0_i32 : i32, i32
  }
}

</mosaic_0001>

<bundles_post_ra>
// kernel: tpu_custom_call.1
= control target key start
LH: loop header
LB: loop body
LE: loop exit
PB: predicated region body
PF: predicated region fallthrough
CT: control target
= control target key end

     0   :  { %7 = vsyncpa [#allocation5], 0  ;;  %s713_s0 = inlined_call_operand.hbm [shape: f32[12,300], index: 0, kind: input, shape index: {}]   ;;  %s714_s1 = inlined_call_operand.vmem [shape: f32[16,1], index: 1, kind: input, shape index: {}]   ;;  %s715_s2 = inlined_call_operand.vmem [shape: f32[16,1], index: 2, kind: output, shape index: {}]  }
   0x1   :  { %9 = vsyncpa [#allocation5 + $0x1], 0  ;;  %s548_s9 = smov 0   ;;  %s550_s10 = smov 0  }
   0x2   :  { %s552_s11 = smov 0   ;;  %s554_s12 = smov 0  }
   0x3   :  { %s556_s13 = smov 0   ;;  %s558_s14 = smov 0  }
   0x4   :  { %s560_s15 = smov 0   ;;  %s562_s16 = smov 0  }
   0x5 LB: > { %s334_s17 = sadd.s32 4294967295, %s527_s16   ;;  %s24_s18 = sadd.s32 1, %s519_s14  ;;  %s527_s16 = sphi %s562_s16, %s15_s16   ;;  %s523_s15 = sphi %s560_s15, %s727_s15   ;;  %s519_s14 = sphi %s558_s14, %s726_s14   ;;  %s515_s13 = sphi %s556_s13, %s725_s13   ;;  %s511_s12 = sphi %s554_s12, %s724_s12   ;;  %s507_s11 = sphi %s552_s11, %s723_s11   ;;  %s503_s10 = sphi %s550_s10, %s722_s10   ;;  %s499_s9 = sphi %s548_s9, %s721_s9  }
   0x6   : > { %p25_p0 = scmp.ge.s32.totalorder %s24_s18, 3  ;;  %s27_s19 = sadd.s32 1, %s523_s15 }
   0x7   : > { %s36_s20 = sadd.s32 1, %s507_s11  ;;  %p43_p1 = scmp.ne.s32.totalorder %s507_s11, %s503_s10 }
   0x8   : > { %s729_s18 = smov (%p25_p0, %s24_s18), 0  ;;  %s731_s19 = smov (!%p25_p0, %s27_s19), %s523_s15 }
   0x9   : > { %s32_s21 = ssub.s32 %s519_s14, %s729_s18  ;;  %p44_p2 = scmp.eq.s32.totalorder %s527_s16, 0 }
   0xa   : > { %p29_p3 = scmp.ge.s32.totalorder %s731_s19, 2  ;;  %p49_p4 = scmp.ne.s32.totalorder %s503_s10, %s499_s9 }
   0xb   : > { %p599_p5 = por %p44_p2, %p43_p1  ;;  %p50_p6 = scmp.eq.s32.totalorder %s334_s17, 0 }
   0xc   : > { %s733_s19 = smov (%p29_p3, %s731_s19), 0  ;;  %p356_p8 = scmp.lt.s32.totalorder %s527_s16, 6 }
   0xd   : > { %p605_p7 = por %p50_p6, %p49_p4  ;;  %s31_s24 = ssub.s32 %s523_s15, %s733_s19 }
   0xe   : > { %s33_s25 = sor.u32 %s32_s21, %s31_s24  ;;  %s125_s26 = sand.u32 1, %s507_s11  }
   0xf   : > { %p34_p9 = scmp.eq.s32.totalorder %s33_s25, 0  ;;  %s338_s27 = sshll.u32 %s125_s26, 3 }
  0x10   : > { %s349_s28 = smul.u32 3, %s523_s15  ;;  %s129_s4 = scalar_lea.vmem [#allocation4], %s338_s27 }
  0x11   : > { %s615_s29 = scalar_select %p34_p9, %s507_s11, %s36_s20  }
  0x12   : > { %s134_s30 = sadd.s32 %s519_s14, %s349_s28  ;;  %s138_s5 = sshll.u32 %s129_s4, 4  ;;  %s623_s5 = int_to_ptr.vmem [resolvable:$true] %s138_s5 }
  0x13   : > { %s339_s3 = sshll.u32 %s134_s30, 7  ;;  %p629_p10 = pnand %p356_p8, %p599_p5 }
  0x14   : > { %s621_s8 = scalar_lea.hbm %s713_s0, %s339_s3  ;;  %s126_s17 = scalar_lea.sflag [#allocation5], %s125_s26 }
  0x15   : > { %s431_s20 = scalar_lea.hbm %s621_s8, 128  ;;  %p433_p0 = pneg %p629_p10 }
  0x16   : > { %p432_p13 = scmp.ne.s32.totalorder %s621_s8, %s431_s20  ;;  %s436_s24 = scalar_lea.hbm %s713_s0, 768 }
  0x17   : > { %p437_p3 = scmp.lt.u32.totalorder %s621_s8, %s713_s0  ;;  %p438_p4 = scmp.lt.u32.totalorder %s436_s24, %s431_s20 }
  0x18   : > { %p434_p1 = pnand %p433_p0, %p432_p13  ;;  %p440_p6 = scmp.lt.u32.totalorder %s431_s20, %s621_s8 }
  0x19   : > { %p439_p5 = por %p438_p4, %p437_p3 }
  0x1a   : > { %p435_p2 = pneg %p434_p1 }
  0x1b   : > { %p441_p8 = por %p440_p6, %p439_p5 }
  0x1d   : > { %p442_p9 = pnand %p441_p8, %p435_p2 }
  0x1f   : > { %445 = shalt.err (!%p442_p9)
}
  0x20   : > { %s446_s26 = scalar_lea.vmem %s623_s5, 128  ;;  %s529_s28 = smov [#allocation4]  }
  0x21   : > { %p447_p13 = scmp.ne.s32.totalorder %s623_s5, %s446_s26  ;;  %s451_s30 = sshll.u32 %s529_s28, 4  ;;  %s452_s30 = int_to_ptr.vmem [resolvable:$false] %s451_s30 }
  0x22   : > { %s453_s3 = scalar_lea.vmem %s452_s30, 256  ;;  %p454_p12 = scmp.lt.s32.totalorder %s623_s5, %s452_s30 }
  0x23   : > { %p449_p1 = pnand %p447_p13, %p433_p0  ;;  %p455_p3 = scmp.lt.s32.totalorder %s453_s3, %s446_s26 }
  0x25   : > { %p450_p11 = pneg %p449_p1  ;;  %p456_p4 = por %p455_p3, %p454_p12 }
  0x27   : > { %p457_p5 = pnand %p456_p4, %p450_p11 }
  0x29   : > { %460 = shalt.err (!%p457_p5)
}
  0x2a   : > { %355 = dma.hbm_to_vmem [thread:$0]  (!%p629_p10), %s621_s8, 128, %s623_s5, %s126_s17  }
  0x2b   : > { %p719_p2 = scmp.lt.s32.totalorder %s527_s16, 7  ;;  %p720_p6 = scmp.ge.s32.totalorder %s527_s16, 1 }
  0x2d   : > { %p151_p0 = pnand %p720_p6, %p719_p2 }
  0x2e   : > { %s156_s4 = sand.u32 (!%p151_p0), 1, %s503_s10  }
  0x2f   : > { %154 = sbr.rel (%p151_p0) target bundleno = 529 (0x211), region = 28  ;;  %s341_s6 = sshll.u32 (!%p151_p0), %s156_s4, 3 }
  0x30   : > { %s157_s7 = scalar_lea.sflag (!%p151_p0), [#allocation5], %s156_s4  ;;  %s160_s20 = scalar_lea.vmem (!%p151_p0), [#allocation4], %s341_s6 }
  0x36   : > { %494 = dma.done.wait (%p605_p7), %s157_s7, 128  }
  0x37   : > { %496 = vsyncadd (%p605_p7), %s157_s7, 4294967168  ;;  %p184_p11 = scmp.lt.s32.totalorder %s515_s13, 1  ;;  %p344_p10 = scmp.ne.s32.totalorder %s511_s12, 0 }
  0x38   : > { %vm196_vm0 = vcmask (!%p344_p10), 7168   ;;  %v530_v0 = vmov (!%p344_p10), -inf   ;;  %v531_v1 = vmov (!%p344_p10), 0.0  }
  0x39   : > { %s735_s13 = smov (!%p184_p11, %s515_s13), 1  ;;  %195 = sbr.rel (%p344_p10) target bundleno = 64 (0x40), region = 36 }
  0x3a   : > { %s342_s5 = sshll.u32 %s735_s13, 3  ;;  %197 = vst.msk [vmem:[#allocation2] sm:$0xff] (!%p344_p10), %vm196_vm0, %v530_v0  ;;  %198 = vst.msk [vmem:[#allocation3] sm:$0xff] (!%p344_p10), %vm196_vm0, %v531_v1 }
  0x3b   : > { %s674_s17 = scalar_lea.vmem %s714_s1, %s342_s5  ;;  %s679_s24 = scalar_lea.vmem %s715_s2, %s342_s5 }
  0x40 PF: > { %v200_v2 = vlaneseq  ;;  %s345_s13 = sshll.u32 %s511_s12, 7  ;;  %v199_v3 = vld [vmem:[%s160_s20] sm:$0xff]  ;;  %v532_v7 = vmov 0   ;;  %vm229_vm2 = vcmask 7168   ;;  %p346_p7 = scmp.ne.s32.totalorder %s511_s12, 2 }
  0x41   : > { %s203_s23 = ssub.s32 300, %s345_s13  ;;  %424 = vset.pattern.permute.xlu0 %v532_v7  ;;  %v207_v8 = vld [vmem:[#allocation2] sm:$0xff]  ;;  %v224_v19 = vld [vmem:[#allocation3] sm:$0xff] }
  0x42   : > { %v201_v4 = vand.u32 127, %v200_v2  ;;  %v204_v5 = vstv %s203_s23  ;;  %v241_v27 = vld [vmem:[%s674_s17] sm:$0xff] (!%p346_p7) }
  0x44   : > { %vm205_vm1 = vcmp.lt.s32.totalorder %v201_v4, %v204_v5 }
  0x45   : > { %v206_v6 = vsel %vm205_vm1, %v199_v3, -inf }
  0x46   : > { %208 = vmax.xlane.f32.xlu0 %v206_v6 }
  0xd3   : > { %v209_v9 = vpop.xlane.xlu0 %208 }
  0xd4   : > { %v210_v10 = vmax.f32 %v207_v8, %v209_v9 }
  0xd6   : > { %231 = vst.msk [vmem:[#allocation2] sm:$0xff] %vm229_vm2, %v210_v10  ;;  %vm211_vm3 = vcmp.eq.f32.partialorder %v210_v10, -inf }
  0xd7   : > { %v212_v11 = vsel %vm211_vm3, 0.0, %v210_v10 }
  0xd8   : > { %218 = vperm.xlu0 %424, %v212_v11   ;;  %v213_v12 = vsub.f32 %v207_v8, %v212_v11 }
  0xda   : > { %v214_v17 = vmul.f32 1.442695, %v213_v12 }
  0xdd   : > { %v236_v25 = vld [vmem:[#allocation2] sm:$0xff] (!%p346_p7) }
 0x157   : > { %v219_v13 = vpop.permute.xlu0 %218 }
 0x158   : > { %v221_v14 = vsub.f32 %v206_v6, %v219_v13 }
 0x15a   : > { %v222_v15 = vmul.f32 1.442695, %v221_v14 }
 0x15c   : > { %425 = vpow2.f32 %v222_v15 }
 0x15d   : > { %427 = vpow2.f32 %v214_v17 }
 0x166   : > { %v426_v16 = vpop.eup %425 }
 0x167   : > { %226 = vadd.xlane.f32.xlu1 %v426_v16  ;;  %v428_v18 = vpop.eup %427 }
 0x168   : > { %v225_v20 = vmul.f32 %v428_v18, %v224_v19 }
 0x1f1   : > { %235 = sbr.rel (%p346_p7) target bundleno = 529 (0x211), region = 40 }
 0x1f4   : > { %v227_v21 = vpop.xlane.xlu1 %226 }
 0x1f5   : > { %v228_v22 = vadd.f32 %v227_v21, %v225_v20 }
 0x1f7   : > { %230 = vst.msk [vmem:[#allocation3] sm:$0xff] %vm229_vm2, %v228_v22 }
 0x1fe   : > { %v237_v23 = vld [vmem:[#allocation3] sm:$0xff] }
 0x1ff   : > { %429 = vlog2.f32 %v237_v23 }
 0x209   : > { %v430_v24 = vpop.eup %429 }
 0x20a   : > { %v239_v26 = vmul.f32 0.6931472, %v430_v24 }
 0x20c   : > { %v240_v28 = vadd.f32 %v239_v26, %v236_v25 }
 0x20e   : > { %v242_v29 = vsub.f32 %v240_v28, %v241_v27 }
 0x210   : > { %243 = vst.msk [vmem:[%s679_s24] sm:$0xff] %vm229_vm2, %v242_v29 }
 0x211 PF: > { %s15_s16 = sadd.s32 1, %s527_s16   ;;  %s721_s9 = smov %s503_s10 }
 0x212   : > { %p12_p12 = scmp.ge.s32.totalorder %s15_s16, 8   ;;  %s722_s10 = smov %s507_s11 }
 0x213   : > { %s723_s11 = smov %s615_s29  ;;  %s724_s12 = smov %s519_s14 }
 0x214   : > { %s725_s13 = smov %s523_s15  ;;  %s726_s14 = smov %s729_s18 }
 0x215   : > { %s727_s15 = smov %s733_s19  ;;  %14 = sbr.rel (!%p12_p12) target bundleno = 5 (0x5), region = 79 }
 0x21c   :  { %263 = vsyncpa [#allocation5], 1 }
 0x21d   :  { %265 = vsyncpa [#allocation5 + $0x1], 1 }

</bundles_post_ra>
